<compile_context>
chip_gen: v7x
topology: tpu7x:2x2x1
jax: 0.10.0
libtpu: 0.0.40
codegen_flags: <defaults>
</compile_context>

<pallas_src>
import functools

import jax
import jax.numpy as jnp
from jax.experimental import pallas as pl
from jax.experimental.pallas import tpu as pltpu


def _arcface_kernel(logits_ref, labels_ref, out_ref, *, s, cos_m, sin_m):
    x = logits_ref[...].astype(jnp.float32)      # (bt, ct) tile, f32 compute
    lab = labels_ref[...]                        # (bt, 1) int32

    bt, ct = x.shape
    col0 = pl.program_id(1) * ct                 # global column offset of this tile

    # Compare the local iota against (label - tile offset): avoids materializing
    # a full-tile global column-id add (review micro-opt).
    local_ids = jax.lax.broadcasted_iota(jnp.int32, (bt, ct), dimension=1)
    is_target = (local_ids == (lab - col0)) & (lab >= 0)

    # cos(arccos(x) + m) = x*cos(m) - sqrt(1 - x^2)*sin(m), arccos(x) in [0, pi].
    # Clamp to [-1, 1] before the identity (matches clipping before arccos).
    xc = jnp.clip(x, -1.0, 1.0)
    sin_theta = jnp.sqrt(jnp.maximum(1.0 - xc * xc, 0.0))
    shifted = xc * cos_m - sin_theta * sin_m

    out_ref[...] = (jnp.where(is_target, shifted, x) * s).astype(out_ref.dtype)


def arcface(logits, labels, *, parameters):
    """parameters = (s, margin) -- matches the torch module's __init__."""
    s = float(parameters[0])
    margin = float(parameters[1])

    B, C = logits.shape
    labels2d = labels.reshape(B, 1).astype(jnp.int32)

    itemsize = jnp.dtype(logits.dtype).itemsize
    sub = 16 if itemsize <= 2 else 8             # packed dtypes tile as (16,128)

    # class (lane) tile: as wide as possible, multiple of 128 (lane-dense stores)
    ct = C if C <= 128 else min(2048, (C // 128) * 128)
    # batch (sublane) tile: multiple of `sub`
    bt = B if B <= sub else min(256, (B // sub) * sub)

    # Keep >= 2 grid steps so v7x's two TensorCores both get work; prefer
    # splitting the batch axis so output blocks stay lane-dense.
    if pl.cdiv(B, bt) * pl.cdiv(C, ct) < 2:
        if bt > sub:
            bt = max(sub, ((bt // 2) // sub) * sub)
        elif ct > 128:
            ct = max(128, ((ct // 2) // 128) * 128)

    grid = (pl.cdiv(B, bt), pl.cdiv(C, ct))

    kernel = functools.partial(
        _arcface_kernel,
        s=s,
        cos_m=float(jnp.cos(jnp.float32(margin))),
        sin_m=float(jnp.sin(jnp.float32(margin))),
    )

    cost = pl.CostEstimate(
        flops=6 * B * C,
        transcendentals=B * C,                   # the sqrt
        bytes_accessed=2 * B * C * itemsize + B * 4,
    )

    return pl.pallas_call(
        kernel,
        out_shape=jax.ShapeDtypeStruct((B, C), logits.dtype),
        grid=grid,
        in_specs=[
            pl.BlockSpec((bt, ct), lambda i, j: (i, j)),
            pl.BlockSpec((bt, 1), lambda i, j: (i, 0)),
        ],
        out_specs=pl.BlockSpec((bt, ct), lambda i, j: (i, j)),
        compiler_params=pltpu.CompilerParams(
            dimension_semantics=("parallel", "parallel"),
            vmem_limit_bytes=32 * 1024 * 1024,
        ),
        cost_estimate=cost,
    )(logits, labels2d)


def _reference(logits, labels, s, margin):
    B, C = logits.shape
    col = jnp.arange(C, dtype=jnp.int32)[None, :]
    mask = (col == labels[:, None]) & (labels[:, None] >= 0)
    theta = jnp.arccos(jnp.clip(logits.astype(jnp.float32), -1.0, 1.0))
    shifted = jnp.cos(theta + margin)
    return jnp.where(mask, shifted, logits.astype(jnp.float32)) * s


if __name__ == "__main__":
    key = jax.random.PRNGKey(0)
    k1, k2 = jax.random.split(key)

    B, C = 16, 640                      # small synthetic head; grid splits on batch
    params = (64.0, 0.5)                # (s, margin)

    logits = jax.random.uniform(k1, (B, C), jnp.float32, -0.9, 0.9)
    labels = jax.random.randint(k2, (B,), 0, C, dtype=jnp.int32)
    labels = labels.at[0].set(-1)       # exercise the ignore (-1) path

    out = arcface(logits, labels, parameters=params)
    jax.block_until_ready(out)

    ref = _reference(logits, labels, *params)
    assert out.shape == (B, C)
    assert jnp.allclose(out, ref, rtol=1e-5, atol=1e-4), float(
        jnp.max(jnp.abs(out - ref)))

    print("KERNEL_OK")
</pallas_src>

<mosaic_0001>
module attributes {stable_mosaic.version = 11 : i64} {
  func.func @_arcface_kernel(%arg0: i32, %arg1: i32, %arg2: memref<8x640xf32, #tpu.memory_space<vmem>>, %arg3: memref<8x1xi32, #tpu.memory_space<vmem>>, %arg4: memref<8x640xf32, #tpu.memory_space<vmem>>) attributes {dimension_semantics = [#tpu.dimension_semantics<parallel>, #tpu.dimension_semantics<parallel>], iteration_bounds = array<i64: 2, 1>, scalar_prefetch = 0 : i64, scratch_operands = 0 : i64, tpu.core_type = #tpu.core_type<tc>, window_params = [{transform_indices = @transform_0, window_bounds = array<i64: 8, 640>}, {transform_indices = @transform_1, window_bounds = array<i64: 8, 1>}, {transform_indices = @transform_2, window_bounds = array<i64: 8, 640>}]} {
    %c0 = arith.constant 0 : index
    %c0_0 = arith.constant 0 : index
    %0 = vector.load %arg2[%c0, %c0_0] : memref<8x640xf32, #tpu.memory_space<vmem>>, vector<8x640xf32>
    %c0_1 = arith.constant 0 : index
    %c0_2 = arith.constant 0 : index
    %1 = vector.load %arg3[%c0_1, %c0_2] : memref<8x1xi32, #tpu.memory_space<vmem>>, vector<8x1xi32>
    %c640_i32 = arith.constant 640 : i32
    %2 = arith.muli %arg1, %c640_i32 : i32
    %3 = tpu.iota {dimensions = array<i32: 1>} : vector<8x640xi32>
    %4 = vector.broadcast %2 : i32 to vector<8x1xi32>
    %5 = arith.subi %1, %4 : vector<8x1xi32>
    %6 = vector.broadcast %5 : vector<8x1xi32> to vector<8x640xi32>
    %7 = arith.cmpi eq, %3, %6 : vector<8x640xi32>
    %c0_i32 = arith.constant 0 : i32
    %8 = vector.broadcast %c0_i32 : i32 to vector<8x1xi32>
    %9 = arith.cmpi sge, %1, %8 : vector<8x1xi32>
    %10 = vector.broadcast %9 : vector<8x1xi1> to vector<8x640xi1>
    %11 = arith.andi %7, %10 : vector<8x640xi1>
    %cst = arith.constant -1.000000e+00 : f32
    %cst_3 = arith.constant 1.000000e+00 : f32
    %12 = vector.broadcast %cst : f32 to vector<8x640xf32>
    %13 = arith.maximumf %12, %0 : vector<8x640xf32>
    %14 = vector.broadcast %cst_3 : f32 to vector<8x640xf32>
    %15 = arith.minimumf %14, %13 : vector<8x640xf32>
    %16 = arith.mulf %15, %15 : vector<8x640xf32>
    %cst_4 = arith.constant 1.000000e+00 : f32
    %17 = vector.broadcast %cst_4 : f32 to vector<8x640xf32>
    %18 = arith.subf %17, %16 : vector<8x640xf32>
    %cst_5 = arith.constant 0.000000e+00 : f32
    %19 = vector.broadcast %cst_5 : f32 to vector<8x640xf32>
    %20 = arith.maximumf %18, %19 : vector<8x640xf32>
    %21 = math.sqrt %20 : vector<8x640xf32>
    %cst_6 = arith.constant 0.87758255 : f32
    %22 = vector.broadcast %cst_6 : f32 to vector<8x640xf32>
    %23 = arith.mulf %15, %22 : vector<8x640xf32>
    %cst_7 = arith.constant 0.47942555 : f32
    %24 = vector.broadcast %cst_7 : f32 to vector<8x640xf32>
    %25 = arith.mulf %21, %24 : vector<8x640xf32>
    %26 = arith.subf %23, %25 : vector<8x640xf32>
    %27 = arith.select %11, %26, %0 : vector<8x640xi1>, vector<8x640xf32>
    %cst_8 = arith.constant 6.400000e+01 : f32
    %28 = vector.broadcast %cst_8 : f32 to vector<8x640xf32>
    %29 = arith.mulf %27, %28 : vector<8x640xf32>
    %c0_9 = arith.constant 0 : index
    %c0_10 = arith.constant 0 : index
    %30 = vector.load %arg4[%c0_9, %c0_10] : memref<8x640xf32, #tpu.memory_space<vmem>>, vector<8x640xf32>
    tpu.vector_store %arg4[%c0_9, %c0_10], %29 {strides = array<i32>} : memref<8x640xf32, #tpu.memory_space<vmem>>, vector<8x640xf32>,
    return
  }
  func.func @transform_0(%arg0: i32, %arg1: i32) -> (i32, i32) {
    %c0_i32 = arith.constant 0 : i32
    return %arg0, %arg1 : i32, i32
  }
  func.func @transform_1(%arg0: i32, %arg1: i32) -> (i32, i32) {
    %c0_i32 = arith.constant 0 : i32
    %c0_i32_0 = arith.constant 0 : i32
    return %arg0, %c0_i32 : i32, i32
  }
  func.func @transform_2(%arg0: i32, %arg1: i32) -> (i32, i32) {
    %c0_i32 = arith.constant 0 : i32
    return %arg0, %arg1 : i32, i32
  }
}

</mosaic_0001>

<bundles_post_ra>
// kernel: tpu_custom_call.1
= control target key start
LH: loop header
LB: loop body
LE: loop exit
PB: predicated region body
PF: predicated region fallthrough
CT: control target
= control target key end

     0   :  { %7 = vsyncpa [#allocation3], 0  ;;  %s888_s0 = inlined_call_operand.hbm [shape: f32[16,640], index: 0, kind: input, shape index: {}]   ;;  %s889_s1 = inlined_call_operand.vmem [shape: s32[16,1], index: 1, kind: input, shape index: {}]   ;;  %s890_s2 = inlined_call_operand.hbm [shape: f32[16,640], index: 2, kind: output, shape index: {}]  }
   0x1   :  { %9 = vsyncpa [#allocation3 + $0x1], 0 }
   0x2   :  { %10 = vsyncpa [#allocation4], 0 }
   0x3   :  { %12 = vsyncpa [#allocation4 + $0x1], 0  ;;  %s659_s9 = smov 0   ;;  %s661_s10 = smov 0  }
   0x4   :  { %s663_s11 = smov 0   ;;  %s665_s12 = smov 0  }
   0x5   :  { %s667_s13 = smov 0   ;;  %s669_s14 = smov 0  }
   0x6 LB: > { %s434_s15 = sadd.s32 4294967295, %s639_s14   ;;  %s435_s16 = sadd.s32 4294967294, %s639_s14   ;;  %s639_s14 = sphi %s669_s14, %s18_s14   ;;  %s635_s13 = sphi %s667_s13, %s905_s13   ;;  %s631_s12 = sphi %s665_s12, %s904_s12   ;;  %s627_s11 = sphi %s663_s11, %s903_s11   ;;  %s623_s10 = sphi %s661_s10, %s902_s10   ;;  %s619_s9 = sphi %s659_s9, %s901_s9  }
   0x7   : > { %s30_s17 = sadd.s32 1, %s635_s13  ;;  %s39_s18 = sadd.s32 1, %s627_s11 }
   0x8   : > { %p32_p0 = scmp.ge.s32.totalorder %s30_s17, 2  ;;  %p46_p1 = scmp.ne.s32.totalorder %s627_s11, %s623_s10 }
   0x9   : > { %p47_p2 = scmp.eq.s32.totalorder %s639_s14, 0  ;;  %p52_p3 = scmp.ne.s32.totalorder %s623_s10, %s619_s9 }
   0xa   : > { %s907_s17 = smov (%p32_p0, %s30_s17), 0  ;;  %p53_p5 = scmp.eq.s32.totalorder %s434_s15, 0 }
   0xb   : > { %p700_p4 = por %p47_p2, %p46_p1  ;;  %s34_s20 = ssub.s32 %s635_s13, %s907_s17 }
   0xc   : > { %p104_p6 = scmp.eq.s32.totalorder %s434_s15, 1  ;;  %p37_p7 = scmp.eq.s32.totalorder %s34_s20, 0 }
   0xd   : > { %p706_p8 = por %p53_p5, %p52_p3  ;;  %p110_p10 = scmp.eq.s32.totalorder %s435_s16, 1 }
   0xe   : > { %p710_p9 = por %p104_p6, %p46_p1  ;;  %p465_p13 = scmp.lt.s32.totalorder %s639_s14, 2 }
   0xf   : > { %s715_s23 = scalar_select %p37_p7, %s627_s11, %s39_s18  }
  0x10   : > { %s894_s22 = scalar_select %p710_p9, 1, 0 }
  0x11   : > { %p717_p11 = por %p110_p10, %p52_p3  ;;  %s130_s25 = sand.u32 1, %s627_s11  }
  0x12   : > { %s449_s26 = smul.u32 40, %s130_s25  ;;  %p727_p0 = pnand %p465_p13, %p700_p4 }
  0x13   : > { %s895_s24 = scalar_select %p717_p11, 1, 0 }
  0x14   : > { %s450_s27 = smul.u32 640, %s635_s13  ;;  %s134_s4 = scalar_lea.vmem [#allocation2], %s449_s26 }
  0x15   : > { %s144_s5 = sshll.u32 %s134_s4, 4  ;;  %s131_s6 = scalar_lea.sflag [#allocation3], %s130_s25  ;;  %s737_s5 = int_to_ptr.vmem [resolvable:$true] %s144_s5 }
  0x16   : > { %s735_s3 = scalar_lea.hbm %s888_s0, %s450_s27  ;;  %p529_p3 = pneg %p727_p0 }
  0x17   : > { %s527_s7 = scalar_lea.hbm %s735_s3, 640  ;;  %s532_s16 = scalar_lea.hbm %s888_s0, 1280 }
  0x18   : > { %p528_p2 = scmp.ne.s32.totalorder %s735_s3, %s527_s7  ;;  %p533_p6 = scmp.lt.u32.totalorder %s735_s3, %s888_s0 }
  0x19   : > { %p534_p7 = scmp.lt.u32.totalorder %s532_s16, %s527_s7  ;;  %p536_p13 = scmp.lt.u32.totalorder %s527_s7, %s735_s3 }
  0x1a   : > { %p530_p4 = pnand %p529_p3, %p528_p2 }
  0x1b   : > { %p535_p10 = por %p534_p7, %p533_p6 }
  0x1c   : > { %p531_p5 = pneg %p530_p4 }
  0x1d   : > { %p537_p12 = por %p536_p13, %p535_p10 }
  0x1f   : > { %p538_p1 = pnand %p537_p12, %p531_p5 }
  0x21   : > { %541 = shalt.err (!%p538_p1)
}
  0x22   : > { %s542_s20 = scalar_lea.vmem %s737_s5, 640  ;;  %s641_s25 = smov [#allocation2]  }
  0x23   : > { %p543_p2 = scmp.ne.s32.totalorder %s737_s5, %s542_s20  ;;  %s547_s26 = sshll.u32 %s641_s25, 4  ;;  %s548_s26 = int_to_ptr.vmem [resolvable:$false] %s547_s26 }
  0x24   : > { %s549_s27 = scalar_lea.vmem %s548_s26, 1280  ;;  %p550_p9 = scmp.lt.s32.totalorder %s737_s5, %s548_s26 }
  0x25   : > { %p545_p4 = pnand %p543_p2, %p529_p3  ;;  %p551_p6 = scmp.lt.s32.totalorder %s549_s27, %s542_s20 }
  0x27   : > { %p546_p11 = pneg %p545_p4  ;;  %p552_p7 = por %p551_p6, %p550_p9 }
  0x29   : > { %p553_p10 = pnand %p552_p7, %p546_p11 }
  0x2b   : > { %556 = shalt.err (!%p553_p10)
}
  0x2c   : > { %460 = dma.hbm_to_vmem [thread:$0]  (!%p727_p0), %s735_s3, 640, %s737_s5, %s131_s6  }
  0x2d   : > { %p156_p12 = scmp.lt.s32.totalorder %s639_s14, 3  ;;  %p897_p1 = scmp.ge.s32.totalorder %s639_s14, 1 }
  0x2f   : > { %p157_p3 = pnand %p897_p1, %p156_p12 }
  0x30   : > { %s768_s29 = sand.u32 (!%p157_p3), 1, %s623_s10  }
  0x31   : > { %160 = sbr.rel (%p157_p3) target bundleno = 219 (0xdb), region = 28  ;;  %s163_s4 = scalar_lea.sflag (!%p157_p3), [#allocation3], %s768_s29 }
  0x32   : > { %s451_s30 = smul.u32 (!%p157_p3), 40, %s768_s29 }
  0x34   : > { %s166_s28 = scalar_lea.vmem (!%p157_p3), [#allocation2], %s451_s30 }
  0x38   : > { %610 = dma.done.wait (%p706_p8), %s163_s4, 640  }
  0x39   : > { %612 = vsyncadd (%p706_p8), %s163_s4, 4294966656  ;;  %p192_p9 = scmp.lt.s32.totalorder %s631_s12, 1  ;;  %v642_v0 = vmov 0   ;;  %v783_v3 = vld [vmem:[%s166_s28] sm:$0xff]  ;;  %v785_v4 = vld [vmem:[%s166_s28 + $0x8] sm:$0xff]  ;;  %v204_v35 = vlaneseq  ;;  %s452_s21 = smul.u32 640, %s631_s12 }
  0x3a   : > { %516 = vset.pattern.permute.xlu0 %v642_v0  ;;  %v787_v5 = vld [vmem:[%s166_s28 + $0x10] sm:$0xff]  ;;  %v789_v6 = vld [vmem:[%s166_s28 + $0x18] sm:$0xff]  ;;  %v792_v7 = vclamps-f32 %v783_v3, 1.0  ;;  %v794_v8 = vld [vmem:[%s166_s28 + $0x20] sm:$0xff]  ;;  %v797_v9 = vclamps-f32 %v785_v4, 1.0  ;;  %s190_s15 = scalar_lea.vmem [#allocation5], %s451_s30 }
  0x3b   : > { %s193_s3 = scalar_select %p192_p9, %s631_s12, 1  ;;  %v800_v10 = vclamps-f32 %v787_v5, 1.0  ;;  %v803_v11 = vclamps-f32 %v789_v6, 1.0  ;;  %v806_v12 = vclamps-f32 %v794_v8, 1.0  ;;  %v205_v51 = vand.u32 127, %v204_v35 }
  0x3c   : > { %v241_v13 = vmul.f32 %v792_v7, %v792_v7  ;;  %v242_v14 = vmul.f32 %v797_v9, %v797_v9  ;;  %v291_v54 = vmul.f32 0.87758255, %v792_v7  ;;  %v292_v58 = vmul.f32 0.87758255, %v797_v9  ;;  %s338_s16 = sshll.u32 %s190_s15, 4  ;;  %s839_s19 = scalar_lea.hbm %s890_s2, %s452_s21  ;;  %s841_s16 = int_to_ptr.vmem [resolvable:$true] %s338_s16 }
  0x3d   : > { %s440_s5 = sshll.u32 %s193_s3, 3  ;;  %v243_v15 = vmul.f32 %v800_v10, %v800_v10  ;;  %v244_v16 = vmul.f32 %v803_v11, %v803_v11  ;;  %v245_v17 = vmul.f32 %v806_v12, %v806_v12  ;;  %v293_v60 = vmul.f32 0.87758255, %v800_v10  ;;  %s322_s20 = scalar_lea.sflag [#allocation4], %s768_s29 }
  0x3e   : > { %s195_s8 = scalar_lea.vmem %s889_s1, %s440_s5  ;;  %v246_v18 = vsub.f32 1.0, %v241_v13  ;;  %v247_v19 = vsub.f32 1.0, %v242_v14  ;;  %v206_v62 = vadd.s32 128, %v205_v51  ;;  %v294_v63 = vmul.f32 0.87758255, %v803_v11  ;;  %s557_s25 = scalar_lea.vmem %s841_s16, 640 }
  0x3f   : > { %v202_v1 = vld [vmem:[%s195_s8] sm:$0xff]  ;;  %v248_v20 = vsub.f32 1.0, %v243_v15  ;;  %v249_v21 = vsub.f32 1.0, %v244_v16  ;;  %v250_v22 = vsub.f32 1.0, %v245_v17  ;;  %v208_v15 = vadd.s32 384, %v205_v51  ;;  %p558_p8 = scmp.ne.s32.totalorder %s841_s16, %s557_s25  ;;  %p898_p11 = scmp.ne.s32.totalorder %s894_s22, 0 }
  0x40   : > { %213 = vperm.xlu0 %516, %v202_v1   ;;  %vm220_vm0 = vcmp.ge.s32.totalorder %v202_v1, 0  ;;  %v251_v23 = vmax.f32 %v246_v18, 0.0  ;;  %v252_v24 = vmax.f32 %v247_v19, 0.0  ;;  %v207_v1 = vadd.s32 256, %v205_v51  ;;  %s643_s26 = smov [#allocation5]  }
  0x41   : > { %v221_v2 = vsel %vm220_vm0, 1, %v642_v0  ;;  %v253_v25 = vmax.f32 %v248_v20, 0.0  ;;  %v254_v26 = vmax.f32 %v249_v21, 0.0  ;;  %v255_v27 = vmax.f32 %v250_v22, 0.0  ;;  %p559_p0 = pnand %p558_p8, %p898_p11  ;;  %s561_s27 = sshll.u32 %s643_s26, 4  ;;  %s562_s27 = int_to_ptr.vmem [resolvable:$false] %s561_s27 }
  0x42   : > { %517 = vrsqrt.f32 %v251_v23  ;;  %vm258_vm1 = vcmp.eq.f32.partialorder %v251_v23, inf  ;;  %vm265_vm2 = vcmp.eq.f32.partialorder %v252_v24, inf  ;;  %vm260_vm3 = vcmp.eq.f32.partialorder %v251_v23, 0.0  ;;  %s563_s30 = scalar_lea.vmem %s562_s27, 1280  ;;  %p564_p13 = scmp.lt.s32.totalorder %s841_s16, %s562_s27 }
  0x43   : > { %519 = vrsqrt.f32 %v252_v24  ;;  %v261_v37 = vand.u32 2147483648, %v251_v23  ;;  %vm272_vm4 = vcmp.eq.f32.partialorder %v253_v25, inf  ;;  %v268_v40 = vand.u32 2147483648, %v252_v24  ;;  %p560_p5 = pneg %p559_p0  ;;  %p565_p2 = scmp.lt.s32.totalorder %s563_s30, %s557_s25 }
  0x44   : > { %223 = vperm.xlu0 %516, %v221_v2   ;;  %521 = vrsqrt.f32 %v253_v25  ;;  %vm279_vm5 = vcmp.eq.f32.partialorder %v254_v26, inf  ;;  %vm267_vm6 = vcmp.eq.f32.partialorder %v252_v24, 0.0  ;;  %v275_v43 = vand.u32 2147483648, %v253_v25 }
  0x45   : > { %523 = vrsqrt.f32 %v254_v26  ;;  %vm286_vm7 = vcmp.eq.f32.partialorder %v255_v27, inf  ;;  %vm274_vm8 = vcmp.eq.f32.partialorder %v253_v25, 0.0  ;;  %v282_v45 = vand.u32 2147483648, %v254_v26  ;;  %p566_p4 = por %p565_p2, %p564_p13 }
  0x46   : > { %525 = vrsqrt.f32 %v255_v27  ;;  %vm281_vm9 = vcmp.eq.f32.partialorder %v254_v26, 0.0  ;;  %v289_v48 = vand.u32 2147483648, %v255_v27  ;;  %vm288_vm10 = vcmp.eq.f32.partialorder %v255_v27, 0.0 }
  0x47   : > { %v295_v2 = vmul.f32 0.87758255, %v806_v12  ;;  %v209_v17 = vadd.s32 512, %v205_v51  ;;  %p567_p6 = pnand %p566_p4, %p560_p5 }
  0x4c   : > { %v518_v28 = vpop.eup %517 }
  0x4d   : > { %v520_v29 = vpop.eup %519  ;;  %v257_v32 = vmul.f32 %v518_v28, %v251_v23 }
  0x4e   : > { %v522_v30 = vpop.eup %521  ;;  %v264_v34 = vmul.f32 %v520_v29, %v252_v24 }
  0x4f   : > { %v524_v31 = vpop.eup %523  ;;  %v271_v36 = vmul.f32 %v522_v30, %v253_v25  ;;  %v259_v39 = vsel %vm258_vm1, %v251_v23, %v257_v32 }
  0x50   : > { %v526_v33 = vpop.eup %525  ;;  %v278_v38 = vmul.f32 %v524_v31, %v254_v26  ;;  %v266_v42 = vsel %vm265_vm2, %v252_v24, %v264_v34  ;;  %v262_v46 = vsel %vm260_vm3, %v261_v37, %v259_v39 }
  0x51   : > { %v285_v41 = vmul.f32 %v526_v33, %v255_v27  ;;  %v273_v44 = vsel %vm272_vm4, %v253_v25, %v271_v36  ;;  %v269_v49 = vsel %vm267_vm6, %v268_v40, %v266_v42  ;;  %v296_v55 = vmul.f32 0.47942555, %v262_v46 }
  0x52   : > { %v280_v47 = vsel %vm279_vm5, %v254_v26, %v278_v38  ;;  %v276_v52 = vsel %vm274_vm8, %v275_v43, %v273_v44  ;;  %v297_v59 = vmul.f32 0.47942555, %v269_v49 }
  0x53   : > { %v287_v50 = vsel %vm286_vm7, %v255_v27, %v285_v41  ;;  %v283_v53 = vsel %vm281_vm9, %v282_v45, %v280_v47  ;;  %v298_v61 = vmul.f32 0.47942555, %v276_v52  ;;  %v301_v14 = vsub.f32 %v291_v54, %v296_v55 }
  0x54   : > { %v290_v57 = vsel %vm288_vm10, %v289_v48, %v287_v50  ;;  %v299_v0 = vmul.f32 0.47942555, %v283_v53  ;;  %v302_v16 = vsub.f32 %v292_v58, %v297_v59 }
  0x55   : > { %v300_v13 = vmul.f32 0.47942555, %v290_v57  ;;  %v303_v9 = vsub.f32 %v293_v60, %v298_v61 }
  0x56   : > { %v304_v10 = vsub.f32 %v294_v63, %v299_v0 }
  0x57   : > { %v305_v11 = vsub.f32 %v295_v2, %v300_v13 }
  0xbf   : > { %v214_v56 = vpop.permute.xlu0 %213 }
  0xc0   : > { %vm215_vm11 = vcmp.eq.s32.totalorder %v205_v51, %v214_v56  ;;  %vm216_vm13 = vcmp.eq.s32.totalorder %v206_v62, %v214_v56  ;;  %vm217_vm15 = vcmp.eq.s32.totalorder %v207_v1, %v214_v56  ;;  %vm218_vm1 = vcmp.eq.s32.totalorder %v208_v15, %v214_v56 }
  0xc1   : > { %vm219_vm3 = vcmp.eq.s32.totalorder %v209_v17, %v214_v56 }
  0xc3   : > { %v224_v7 = vpop.permute.xlu0 %223 }
  0xc4   : > { %vm225_vm12 = vcmp.eq.s32.totalorder %v224_v7, 1 }
  0xc5   : > { %vm226_vm14 = vmand %vm215_vm11, %vm225_vm12 }
  0xc6   : > { %vm227_vm0 = vmand %vm216_vm13, %vm225_vm12  ;;  %v306_v12 = vsel %vm226_vm14, %v301_v14, %v783_v3 }
  0xc7   : > { %vm228_vm2 = vmand %vm217_vm15, %vm225_vm12  ;;  %v307_v18 = vsel %vm227_vm0, %v302_v16, %v785_v4  ;;  %v311_v19 = vmul.f32 64.0, %v306_v12 }
  0xc8   : > { %vm229_vm4 = vmand %vm218_vm1, %vm225_vm12  ;;  %v308_v20 = vsel %vm228_vm2, %v303_v9, %v787_v5  ;;  %v312_v21 = vmul.f32 64.0, %v307_v18 }
  0xc9   : > { %vm230_vm5 = vmand %vm219_vm3, %vm225_vm12  ;;  %v309_v3 = vsel %vm229_vm4, %v304_v10, %v789_v6  ;;  %v313_v22 = vmul.f32 64.0, %v308_v20  ;;  %316 = vst [vmem:[%s190_s15] sm:$0xff] %v311_v19 }
  0xca   : > { %v310_v4 = vsel %vm230_vm5, %v305_v11, %v794_v8  ;;  %v314_v23 = vmul.f32 64.0, %v309_v3  ;;  %317 = vst [vmem:[%s190_s15 + $0x8] sm:$0xff] %v312_v21 }
  0xcb   : > { %v315_v24 = vmul.f32 64.0, %v310_v4  ;;  %318 = vst [vmem:[%s190_s15 + $0x10] sm:$0xff] %v313_v22 }
  0xcc   : > { %319 = vst [vmem:[%s190_s15 + $0x18] sm:$0xff] %v314_v23 }
  0xcd   : > { %320 = vst [vmem:[%s190_s15 + $0x20] sm:$0xff] %v315_v24 }
  0xce   : > { %570 = shalt.err (!%p567_p6)
}
  0xcf   : > { %s571_s29 = scalar_lea.hbm %s839_s19, 640  ;;  %s575_s3 = scalar_lea.hbm %s890_s2, 1280 }
  0xd0   : > { %p572_p7 = scmp.ne.s32.totalorder %s839_s19, %s571_s29  ;;  %p576_p1 = scmp.lt.u32.totalorder %s839_s19, %s890_s2 }
  0xd1   : > { %p577_p3 = scmp.lt.u32.totalorder %s575_s3, %s571_s29  ;;  %p579_p8 = scmp.lt.u32.totalorder %s571_s29, %s839_s19 }
  0xd2   : > { %p573_p10 = pnand %p572_p7, %p898_p11 }
  0xd3   : > { %p578_p9 = por %p577_p3, %p576_p1 }
  0xd4   : > { %p574_p12 = pneg %p573_p10 }
  0xd5   : > { %p580_p0 = por %p579_p8, %p578_p9 }
  0xd7   : > { %p581_p5 = pnand %p580_p0, %p574_p12 }
  0xd9   : > { %584 = shalt.err (!%p581_p5)
}
  0xda   : > { %455 = dma.vmem_to_hbm [thread:$0]  (%p898_p11), %s841_s16, 640, %s839_s19, %s322_s20  }
  0xdb PF: > { %s350_s7 = sand.u32 1, %s619_s9   ;;  %p899_p13 = scmp.ne.s32.totalorder %s895_s24, 0 }
  0xdc   : > { %p900_p2 = scmp.ge.s32.totalorder %s639_s14, 2  ;;  %s351_s8 = scalar_lea.sflag [#allocation4], %s350_s7 }
  0xde   : > { %p462_p4 = pnand %p900_p2, %p899_p13 }
  0xe0   : > { %614 = dma.done.wait (!%p462_p4), %s351_s8, 640  }
  0xe1   : > { %616 = vsyncadd (!%p462_p4), %s351_s8, 4294966656  ;;  %s18_s14 = sadd.s32 1, %s639_s14   ;;  %s901_s9 = smov %s623_s10 }
  0xe2   : > { %p15_p6 = scmp.ge.s32.totalorder %s18_s14, 4   ;;  %s902_s10 = smov %s627_s11 }
  0xe3   : > { %s903_s11 = smov %s715_s23  ;;  %s904_s12 = smov %s635_s13 }
  0xe4   : > { %s905_s13 = smov %s907_s17  ;;  %17 = sbr.rel (!%p15_p6) target bundleno = 6 (0x6), region = 76 }
  0xeb   :  { %356 = vsyncpa [#allocation3], 1 }
  0xec   :  { %358 = vsyncpa [#allocation3 + $0x1], 1 }
  0xed   :  { %359 = vsyncpa [#allocation4], 1 }
  0xee   :  { %361 = vsyncpa [#allocation4 + $0x1], 1 }

</bundles_post_ra>
